<compile_context>
chip_gen: v5e
topology: v5e:2x2
jax: 0.10.0
libtpu: 0.0.40
codegen_flags: <defaults>
</compile_context>

<pallas_src>
import numpy as np
import jax
import jax.numpy as jnp
from jax.experimental import pallas as pl
from jax.experimental.pallas import tpu as pltpu


def _torch_result_dtype(scalar_dtype, tensor_dtype):
    """torch promotion for (0-dim scalar tensor) + (dimensioned tensor):
    the 0-dim operand only determines the result dtype if it is of a strictly
    higher category (bool < int < float < complex); otherwise the dimensioned
    tensor's dtype wins (e.g. f64 scalar-tensor + f32 tensor -> f32)."""
    def cat(dt):
        dt = jnp.dtype(dt)
        if dt == jnp.dtype(jnp.bool_):
            return 0
        if jnp.issubdtype(dt, jnp.integer):
            return 1
        if jnp.issubdtype(dt, jnp.floating):
            return 2
        return 3  # complex
    s, t = jnp.dtype(scalar_dtype), jnp.dtype(tensor_dtype)
    out = s if cat(s) > cat(t) else t
    return jax.dtypes.canonicalize_dtype(out)


def _choose_width(n, max_width=4096):
    """Largest multiple of 128 that divides n, capped at max_width (0 if none)."""
    best = 0
    c = 128
    while c <= min(n, max_width):
        if n % c == 0:
            best = c
        c += 128
    return best


def _make_kernel(scalar, out_dtype):
    # Static constant: folded directly into the vector add, no SMEM load.
    s = np.asarray(scalar, dtype=out_dtype)[()]

    def kernel(x_ref, o_ref):
        o_ref[...] = x_ref[...].astype(out_dtype) + s

    return kernel


def scalar_tensor_add(x, scalar, scalar_dtype=jnp.float32):
    """Equivalent of ScalarTensor.forward: torch.scalar_tensor(scalar, dtype) + x."""
    out_dtype = _torch_result_dtype(scalar_dtype, x.dtype)
    orig_shape = x.shape
    n = int(x.size)

    in_itemsize = jnp.dtype(x.dtype).itemsize
    out_itemsize = jnp.dtype(out_dtype).itemsize

    C = _choose_width(n)
    if C:
        # Zero-copy layout: a flat reshape of a contiguous array is free.
        x2d = x.reshape(n // C, C)
        pad = 0
    else:
        # Ragged total size: pad only the small (< C) remainder of the flat view.
        # TODO(synk): a pl.ANY + manual-DMA kernel could avoid this small pad/slice copy.
        C = 1024 if n >= 1024 else 128
        pad = (-n) % C
        x2d = jnp.pad(x.reshape(-1), (0, pad)).reshape(-1, C)

    R = x2d.shape[0]

    # Sublane multiple for the narrower dtype (8 for f32, 16 for bf16, 32 for int8).
    sub = max(8, 32 // min(in_itemsize, out_itemsize))
    # ~2 MiB per (larger-dtype) buffer -> ~8 MiB total with double-buffered in+out.
    tile_r = ((2 << 20) // (C * max(in_itemsize, out_itemsize))) // sub * sub
    tile_r = max(sub, tile_r)
    if tile_r >= R:
        tile_r = R  # full-extent block is always a legal block shape

    grid = (pl.cdiv(R, tile_r),)

    out2d = pl.pallas_call(
        _make_kernel(scalar, out_dtype),
        out_shape=jax.ShapeDtypeStruct((R, C), out_dtype),
        grid=grid,
        in_specs=[pl.BlockSpec((tile_r, C), lambda i: (i, 0))],
        out_specs=pl.BlockSpec((tile_r, C), lambda i: (i, 0)),
        compiler_params=pltpu.CompilerParams(
            dimension_semantics=("parallel",),
        ),
        cost_estimate=pl.CostEstimate(
            flops=n,
            transcendentals=0,
            bytes_accessed=n * in_itemsize + n * out_itemsize,
        ),
    )(x2d)

    if pad:
        return out2d.reshape(-1)[:n].reshape(orig_shape)
    return out2d.reshape(orig_shape)


if __name__ == "__main__":
    key = jax.random.PRNGKey(0)

    # Primary NCHW shape implied by the module's test.
    x = jax.random.normal(key, (2, 4, 16, 16), dtype=jnp.float32)
    scalar = 3.5
    out = jax.block_until_ready(scalar_tensor_add(x, scalar, scalar_dtype=jnp.float32))
    ref = x + jnp.float32(scalar)
    assert out.shape == ref.shape and out.dtype == ref.dtype
    assert jnp.allclose(out, ref, atol=1e-6), "mismatch vs reference (fast path)"

    # Ragged total size -> small-remainder pad path.
    x2 = jax.random.normal(jax.random.PRNGKey(1), (3, 5, 7), dtype=jnp.float32)
    out2 = jax.block_until_ready(scalar_tensor_add(x2, -1.25, scalar_dtype=jnp.float32))
    assert jnp.allclose(out2, x2 + jnp.float32(-1.25), atol=1e-6), "mismatch (ragged path)"

    # Larger input -> multi-tile "parallel" grid (exercises pipelined tiling).
    x3 = jax.random.normal(jax.random.PRNGKey(2), (16, 8, 64, 128), dtype=jnp.float32)
    out3 = jax.block_until_ready(scalar_tensor_add(x3, 0.5, scalar_dtype=jnp.float32))
    assert jnp.allclose(out3, x3 + jnp.float32(0.5), atol=1e-6), "mismatch (tiled path)"

    # torch 0-dim promotion rule: float64 scalar tensor + float32 tensor -> float32.
    out4 = jax.block_until_ready(scalar_tensor_add(x, 2.0, scalar_dtype=jnp.float64))
    assert out4.dtype == jnp.float32
    assert jnp.allclose(out4, x + jnp.float32(2.0), atol=1e-6), "mismatch (promotion)"

    print("KERNEL_OK")
</pallas_src>

<mosaic_0001>
module attributes {stable_mosaic.version = 11 : i64} {
  func.func @kernel(%arg0: i32, %arg1: memref<1x2048xf32, #tpu.memory_space<vmem>>, %arg2: memref<1x2048xf32, #tpu.memory_space<vmem>>) attributes {dimension_semantics = [#tpu.dimension_semantics<parallel>], iteration_bounds = array<i64: 1>, scalar_prefetch = 0 : i64, scratch_operands = 0 : i64, tpu.core_type = #tpu.core_type<tc>, window_params = [{transform_indices = @transform_0, window_bounds = array<i64: 1, 2048>}, {transform_indices = @transform_1, window_bounds = array<i64: 1, 2048>}]} {
    %c0 = arith.constant 0 : index
    %c0_0 = arith.constant 0 : index
    %0 = vector.load %arg1[%c0, %c0_0] : memref<1x2048xf32, #tpu.memory_space<vmem>>, vector<1x2048xf32>
    %cst = arith.constant 3.500000e+00 : f32
    %1 = vector.broadcast %cst : f32 to vector<1x2048xf32>
    %2 = arith.addf %0, %1 : vector<1x2048xf32>
    %c0_1 = arith.constant 0 : index
    %c0_2 = arith.constant 0 : index
    %3 = vector.load %arg2[%c0_1, %c0_2] : memref<1x2048xf32, #tpu.memory_space<vmem>>, vector<1x2048xf32>
    tpu.vector_store %arg2[%c0_1, %c0_2], %2 {strides = array<i32>} : memref<1x2048xf32, #tpu.memory_space<vmem>>, vector<1x2048xf32>,
    return
  }
  func.func @transform_0(%arg0: i32) -> (i32, i32) {
    %c0_i32 = arith.constant 0 : i32
    %c0_i32_0 = arith.constant 0 : i32
    return %arg0, %c0_i32 : i32, i32
  }
  func.func @transform_1(%arg0: i32) -> (i32, i32) {
    %c0_i32 = arith.constant 0 : i32
    %c0_i32_0 = arith.constant 0 : i32
    return %arg0, %c0_i32 : i32, i32
  }
}

</mosaic_0001>

<bundles_post_ra>
// kernel: tpu_custom_call.1
= control target key start
LH: loop header
LB: loop body
LE: loop exit
PB: predicated region body
PF: predicated region fallthrough
CT: control target
= control target key end

     0   :  { %6 = vsyncpa [#allocation3], 0  ;;  %s118_s0 = inlined_call_operand.hbm [shape: f32[1,2048], index: 0, kind: input, shape index: {}]   ;;  %s119_s1 = inlined_call_operand.hbm [shape: f32[1,2048], index: 1, kind: output, shape index: {}]  }
   0x1   :  { %7 = vsyncpa [#allocation4], 0  ;;  %s13_s8 = sshll.u32 %s118_s0, 4  ;;  %s100_s9 = smov [#allocation2]   ;;  %s14_s8 = int_to_ptr.hbm [resolvable:$true] %s13_s8 }
   0x2   :  { %s15_s10 = sshll.u32 %s100_s9, 4  ;;  %s16_s10 = int_to_ptr.vmem [resolvable:$true] %s15_s10 }
   0x3   :  { %18 = dma.hbm_to_vmem [thread:$0]  %s14_s8, 256, %s16_s10, [#allocation3]  }
   0x4   :  { %96 = dma.done.wait [#allocation3], 256  }
   0x5   :  { %97 = vsyncadd [#allocation3], 4294967040  ;;  %s101_s11 = smov [#allocation5]   ;;  %s36_s15 = sshll.u32 %s119_s1, 4  ;;  %v23_v0 = vld [vmem:[#allocation2] sm:$0xff]  ;;  %v24_v1 = vld [vmem:[#allocation2 + $0x8] sm:$0xff]  ;;  %s37_s15 = int_to_ptr.hbm [resolvable:$true] %s36_s15 }
   0x6   :  { %s34_s12 = sshll.u32 %s101_s11, 4  ;;  %v25_v2 = vadd.f32 3.5, %v23_v0  ;;  %v26_v3 = vadd.f32 3.5, %v24_v1  ;;  %s35_s12 = int_to_ptr.vmem [resolvable:$true] %s34_s12 }
   0x8   :  { %27 = vst [vmem:[#allocation5] sm:$0xff] %v25_v2 }
   0x9   :  { %28 = vst [vmem:[#allocation5 + $0x8] sm:$0xff] %v26_v3 }
   0xa   :  { %39 = dma.vmem_to_hbm [thread:$0]  %s35_s12, 256, %s37_s15, [#allocation4]  }
   0xb   :  { %98 = dma.done.wait [#allocation4], 256  }
   0xc   :  { %99 = vsyncadd [#allocation4], 4294967040 }
   0xd   :  { %44 = vsyncpa [#allocation3], 1 }
   0xe   :  { %45 = vsyncpa [#allocation4], 1 }

</bundles_post_ra>
